<compile_context>
chip_gen: v7x
topology: tpu7x:2x2x1
jax: 0.10.0
libtpu: 0.0.40
codegen_flags: <defaults>
</compile_context>

<pallas_src>
import numpy as np
import jax
import jax.numpy as jnp
from jax.experimental import pallas as pl
from jax.experimental.pallas import tpu as pltpu

EMBED_DIM = 8
NUM_GCN_LAYERS = 2
N_ACTIONS_FORGET = 3
N_ACTIONS_REMEMBER = 2
OUT_LANES = 128          # lane-dense head / output width
NEG_INF = -1e30


def _round_up(n, m):
    return -(-n // m) * m


def _offsets(counts):
    off, acc = [], 0
    for c in counts:
        off.append(acc)
        acc += c
    return off


# --------------------------------------------------------------------------
# Host-side weight packing: 2 contiguous slabs instead of ~20 tiny DMAs
# --------------------------------------------------------------------------
def _pad_rows(a, mult=8):
    pad = (-a.shape[0]) % mult
    if pad:
        a = jnp.concatenate([a, jnp.zeros((pad, a.shape[1]), a.dtype)], axis=0)
    return a


def _pad_lanes(a, lanes=OUT_LANES):
    return jnp.concatenate(
        [a, jnp.zeros((a.shape[0], lanes - a.shape[1]), a.dtype)], axis=1)


def _build_slab(pieces):
    """Stack (name, [rows, cols]) pieces, each padded to 8-row alignment."""
    offs, chunks, r = {}, [], 0
    for name, a in pieces:
        a = _pad_rows(jnp.asarray(a, jnp.float32))
        offs[name] = r
        chunks.append(a)
        r += a.shape[0]
    return jnp.concatenate(chunks, axis=0), offs


def pack_weights(params, batch_pad):
    d = EMBED_DIM
    mf, mr = params['mlp_forget'], params['mlp_remember']

    pieces_d = []
    for l in range(NUM_GCN_LAYERS):
        pieces_d.append((f'gcn_w{l}', params['gcn_w'][l]))       # (d, d)
        pieces_d.append((f'gcn_b{l}', params['gcn_b'][l]))       # (1, d)
    pieces_d += [
        # attention weight pre-broadcast to batch_pad rows (avoids 1-row matmul)
        ('att_w', jnp.tile(params['att_w'], (batch_pad, 1))),    # (B_pad, d)
        ('f_w1', mf['w1']), ('f_b1', mf['b1']),
        ('f_w2', mf['w2']), ('f_b2', mf['b2']),
        # remember w1 split by role -> 3 matmuls summed (no lane concat of triple)
        ('r_w1s', mr['w1'][0:d]),
        ('r_w1r', mr['w1'][d:2 * d]),
        ('r_w1d', mr['w1'][2 * d:3 * d]),
        ('r_b1', mr['b1']),
        ('r_w2', mr['w2']), ('r_b2', mr['b2']),
    ]
    slab_d, off_d = _build_slab(pieces_d)                        # [120, d]

    pieces_h = [
        ('f_wh', _pad_lanes(mf['wh'])), ('f_bh', _pad_lanes(mf['bh'])),
        ('r_wh', _pad_lanes(mr['wh'])), ('r_bh', _pad_lanes(mr['bh'])),
    ]
    slab_h, off_h = _build_slab(pieces_h)                        # [32, 128]
    return slab_d, off_d, slab_h, off_h


# --------------------------------------------------------------------------
# Fused Pallas kernel: GCN stack + segment-softmax pooling + both dueling heads
# --------------------------------------------------------------------------
def make_fused_kernel(off_d, off_h):
    d = EMBED_DIM
    f32 = jnp.float32

    def kernel(att_b_ref, x0_ref, adj_ref, rel_ref, mask_ref, ids_ref,
               sd_ref, sh_ref, qf_ref, qr_ref):
        n_total = x0_ref.shape[0]
        n_rel = rel_ref.shape[0]
        b_pad = mask_ref.shape[0]
        s_pad = ids_ref.shape[0]

        def sd(name, rows=d):                 # 8-row-aligned static slices
            return sd_ref[pl.ds(off_d[name], rows), :]

        def sh(name, rows=d):
            return sh_ref[pl.ds(off_h[name], rows), :]

        # ---- GCN stack: x <- relu(A @ (x @ W_l) + b_l) -----------------------
        x = x0_ref[...]                                           # [N, d]
        adj = adj_ref[...]                                        # [N, N]
        for l in range(NUM_GCN_LAYERS):
            xw = jnp.dot(x, sd(f'gcn_w{l}'), preferred_element_type=f32)
            x = jnp.maximum(jnp.dot(adj, xw, preferred_element_type=f32)
                            + sd(f'gcn_b{l}', 1), 0.0)

        def mlp_tail(h, w2, b2, wh, bh, n_act):
            # Q = V + A - mean(A); wh/bh already zero-padded to 128 lanes, so
            # the head matmul produces the lane-dense output tile directly.
            h = jnp.maximum(jnp.dot(h, w2, preferred_element_type=f32) + b2, 0.0)
            head = jnp.dot(h, wh, preferred_element_type=f32) + bh    # [rows,128]
            adv = head[:, :n_act]
            val = head[:, n_act:n_act + 1]
            return head + (val - jnp.mean(adv, axis=-1, keepdims=True))

        # ---- 'forget' head: vectorized masked segment softmax ----------------
        mask = mask_ref[...]                                      # [B_pad, N]
        # scores[b, n] = <att_w, x[n]> + b  (att_w pre-broadcast to B_pad rows;
        # contraction on the last dims = rhs-transposed matmul)
        scores = jax.lax.dot_general(
            sd('att_w', b_pad), x,
            dimension_numbers=(((1,), (1,)), ((), ())),
            preferred_element_type=f32) + att_b_ref[0]            # [B_pad, N]
        sm = jnp.where(mask > 0.0, scores, NEG_INF)
        m = jnp.max(sm, axis=-1, keepdims=True)                   # [B_pad, 1]
        e = jnp.exp(sm - m) * mask
        den = jnp.maximum(jnp.sum(e, axis=-1, keepdims=True), 1e-30)
        p = e / den                                               # exact softmax
        agg = jnp.dot(p, x, preferred_element_type=f32)           # [B_pad, d]

        hf = jnp.maximum(jnp.dot(agg, sd('f_w1'), preferred_element_type=f32)
                         + sd('f_b1', 1), 0.0)
        qf_ref[...] = mlp_tail(hf, sd('f_w2'), sd('f_b2', 1),
                               sh('f_wh'), sh('f_bh', 1), N_ACTIONS_FORGET)

        # ---- 'remember' head: vectorized one-hot triple gather ---------------
        ids = ids_ref[...]                                        # [S_pad, 3] int32
        lane_n = jax.lax.broadcasted_iota(jnp.int32, (s_pad, n_total), 1)
        lane_r = jax.lax.broadcasted_iota(jnp.int32, (s_pad, n_rel), 1)
        sel_src = jnp.where(lane_n == ids[:, 0:1], 1.0, 0.0)      # [S_pad, N]
        sel_rel = jnp.where(lane_r == ids[:, 1:2], 1.0, 0.0)      # [S_pad, R2]
        sel_dst = jnp.where(lane_n == ids[:, 2:3], 1.0, 0.0)      # [S_pad, N]
        src = jnp.dot(sel_src, x, preferred_element_type=f32)              # [S_pad, d]
        rel = jnp.dot(sel_rel, rel_ref[...], preferred_element_type=f32)   # [S_pad, d]
        dst = jnp.dot(sel_dst, x, preferred_element_type=f32)              # [S_pad, d]

        # triple @ r_w1  ==  src @ r_w1s + rel @ r_w1r + dst @ r_w1d  (no concat)
        hr = jnp.maximum(
            jnp.dot(src, sd('r_w1s'), preferred_element_type=f32)
            + jnp.dot(rel, sd('r_w1r'), preferred_element_type=f32)
            + jnp.dot(dst, sd('r_w1d'), preferred_element_type=f32)
            + sd('r_b1', 1), 0.0)
        qr_ref[...] = mlp_tail(hr, sd('r_w2'), sd('r_b2', 1),
                               sh('r_wh'), sh('r_bh', 1), N_ACTIONS_REMEMBER)

    return kernel


def gnn_forward_both(params, graph):
    """Single fused Pallas call: one GCN pass feeds both policy heads."""
    meta = graph['meta']
    batch = len(meta['ent_counts'])
    num_short = meta['num_short_total']
    b_pad = graph['seg_mask'].shape[0]
    s_pad = graph['short_ids'].shape[0]

    slab_d, off_d, slab_h, off_h = pack_weights(params, b_pad)

    smem = pl.BlockSpec(memory_space=pltpu.MemorySpace.SMEM)
    vmem = pl.BlockSpec(memory_space=pltpu.MemorySpace.VMEM)

    # TODO(synk): for real workloads add a leading grid axis over graphs with
    #             dimension_semantics=("parallel",) to use v7x's second core.
    qf, qr = pl.pallas_call(
        make_fused_kernel(off_d, off_h),
        out_shape=[jax.ShapeDtypeStruct((b_pad, OUT_LANES), jnp.float32),
                   jax.ShapeDtypeStruct((s_pad, OUT_LANES), jnp.float32)],
        in_specs=[smem] + [vmem] * 7,
        out_specs=[vmem, vmem],
    )(params['att_b'], graph['x0'], graph['adj'], graph['rel_emb'],
      graph['seg_mask'], graph['short_ids'], slab_d, slab_h)

    q_forget = qf[:batch, :N_ACTIONS_FORGET]                       # [B, 3]
    q_remember = qr[:num_short, :N_ACTIONS_REMEMBER]               # [S, 2]
    return q_forget, q_remember


def gnn_forward(params, graph, policy_type, fused=None):
    """Per-policy API matching the reference module.  Pass `fused`
    (= gnn_forward_both result) to reuse one GCN pass for both policies."""
    qf, qr = fused if fused is not None else gnn_forward_both(params, graph)
    meta = graph['meta']
    if policy_type == 'remember':
        out, start = [], 0
        for n in meta['num_short_memories']:
            out.append(qr[start:start + n])
            start += n
        return out
    elif policy_type == 'forget':
        return [qf[i:i + 1] for i in range(len(meta['ent_counts']))]
    else:
        raise ValueError(f'{policy_type} is not a valid policy type.')


# --------------------------------------------------------------------------
# Parameter construction (deterministic, synthetic)
# --------------------------------------------------------------------------
def xavier_normal(key, shape):
    std = (2.0 / (shape[0] + shape[1])) ** 0.5
    return std * jax.random.normal(key, shape, dtype=jnp.float32)


def make_mlp_params(key, in_dim, hid_dim, n_actions):
    ks = jax.random.split(key, 4)
    wa = xavier_normal(ks[2], (hid_dim, n_actions))   # advantage head
    wv = xavier_normal(ks[3], (hid_dim, 1))           # value head
    return {
        'w1': xavier_normal(ks[0], (in_dim, hid_dim)),
        'b1': jnp.zeros((1, hid_dim), jnp.float32),
        'w2': xavier_normal(ks[1], (hid_dim, hid_dim)),
        'b2': jnp.zeros((1, hid_dim), jnp.float32),
        # heads packed side-by-side: [:, :n_actions] = adv, [:, n_actions] = val
        'wh': jnp.concatenate([wa, wv], axis=1),
        'bh': jnp.zeros((1, n_actions + 1), jnp.float32),
    }


def make_params(key, num_entities, num_relations, d):
    ks = jax.random.split(key, 8)
    entity_table = xavier_normal(ks[0], (num_entities, d))
    # Rotational relation embeddings: [2 * num_relations, d]
    phases = 2.0 * np.pi * jax.random.uniform(ks[1], (num_relations, d // 2),
                                              dtype=jnp.float32)
    cos, sin = jnp.cos(phases), jnp.sin(phases)
    relation_table = jnp.concatenate(
        [jnp.concatenate([cos, sin], axis=-1),
         jnp.concatenate([cos, -sin], axis=-1)], axis=0)
    gcn_w = jnp.stack([xavier_normal(ks[2 + i], (d, d))
                       for i in range(NUM_GCN_LAYERS)], axis=0)      # [L, d, d]
    gcn_b = jnp.zeros((NUM_GCN_LAYERS, 1, d), jnp.float32)           # [L, 1, d]
    return {
        'entity_table': entity_table,
        'relation_table': relation_table,
        'gcn_w': gcn_w,
        'gcn_b': gcn_b,
        'att_w': xavier_normal(ks[4], (1, d)),        # attention score weight
        'att_b': jnp.zeros((1,), jnp.float32),        # SMEM scalar
        'mlp_forget': make_mlp_params(ks[5], d, d, N_ACTIONS_FORGET),
        'mlp_remember': make_mlp_params(ks[6], 3 * d, d, N_ACTIONS_REMEMBER),
    }


# --------------------------------------------------------------------------
# Synthetic batched graph (replaces process_batch / process_graph glue)
# --------------------------------------------------------------------------
def build_graph(params):
    # sample 0: 5 entities (global ids 0..4), relations [0,1,2], 6 edges
    # sample 1: 4 entities (global ids 5..8), relations [1,3],   5 edges
    ent_ids = [[0, 1, 2, 3, 4], [5, 6, 7, 8]]
    rel_ids = [[0, 1, 2], [1, 3]]
    edges = [  # (src_local, dst_local, rel_local)
        ([0, 1, 2, 3, 0, 4], [1, 2, 3, 4, 2, 0], [0, 1, 2, 0, 1, 2]),
        ([0, 1, 2, 3, 0], [1, 2, 3, 0, 2], [0, 1, 0, 1, 0]),
    ]
    short_local = [[0, 1], [0, 1, 2]]

    ent_counts = [len(e) for e in ent_ids]
    n_fwd = sum(ent_counts)
    r_fwd = sum(len(r) for r in rel_ids)
    ent_off = _offsets(ent_counts)
    rel_off = _offsets([len(r) for r in rel_ids])
    edge_off = _offsets([len(e[0]) for e in edges])

    # node features: gathered entity embeddings, duplicated (fwd + inverse)
    gathered_ent = jnp.take(params['entity_table'],
                            jnp.array(sum(ent_ids, []), jnp.int32), axis=0)
    x0 = jnp.concatenate([gathered_ent, gathered_ent], axis=0)       # [2*n_fwd, d]

    gathered_rel = jnp.take(params['relation_table'],
                            jnp.array(sum(rel_ids, []), jnp.int32), axis=0)
    rel_emb = jnp.concatenate([gathered_rel, gathered_rel], axis=0)  # [2*r_fwd, d]

    src_f, dst_f, typ_f = [], [], []
    for s, (srcs, dsts, typs) in enumerate(edges):
        src_f += [v + ent_off[s] for v in srcs]
        dst_f += [v + ent_off[s] for v in dsts]
        typ_f += [t + rel_off[s] for t in typs]
    # inverse edges: flipped, node ids + n_fwd, relation ids + r_fwd
    src_all = src_f + [v + n_fwd for v in dst_f]
    dst_all = dst_f + [v + n_fwd for v in src_f]
    typ_all = typ_f + [t + r_fwd for t in typ_f]

    n_total = 2 * n_fwd
    adj = jnp.zeros((n_total, n_total), jnp.float32)
    adj = adj.at[jnp.array(dst_all), jnp.array(src_all)].add(1.0)    # A[dst, src]

    # static per-sample segment mask over the FORWARD node rows (host-built)
    batch = len(ent_counts)
    b_pad = max(8, _round_up(batch, 8))
    seg_mask = np.zeros((b_pad, n_total), np.float32)
    for i, (st, cnt) in enumerate(zip(ent_off, ent_counts)):
        seg_mask[i, st:st + cnt] = 1.0

    # short-term memory triples pre-gathered host-side: (src, rel, dst) ids;
    # pad rows use -1 (matches no node/relation -> zero one-hot rows).
    short_idx = []
    for s, loc in enumerate(short_local):
        short_idx += [i + edge_off[s] for i in loc]
    num_short_memories = [len(s) for s in short_local]
    num_short_total = len(short_idx)
    s_pad = max(8, _round_up(num_short_total, 8))
    short_ids = np.full((s_pad, 3), -1, np.int32)
    for row, e in enumerate(short_idx):
        short_ids[row] = (src_all[e], typ_all[e], dst_all[e])

    return {
        'x0': x0,
        'rel_emb': rel_emb,
        'adj': adj,
        'seg_mask': jnp.asarray(seg_mask),
        'short_ids': jnp.asarray(short_ids),
        'meta': {
            'ent_counts': ent_counts,
            'num_short_memories': num_short_memories,
            'num_short_total': num_short_total,
        },
    }


# --------------------------------------------------------------------------
if __name__ == "__main__":
    key = jax.random.PRNGKey(0)
    num_entities, num_relations = 10, 4
    params = make_params(key, num_entities, num_relations, EMBED_DIM)
    graph = build_graph(params)

    # One fused Pallas call; both policies share the single GCN pass.
    fused = gnn_forward_both(params, graph)
    q_forget = gnn_forward(params, graph, 'forget', fused=fused)
    q_remember = gnn_forward(params, graph, 'remember', fused=fused)

    for q in q_forget + q_remember:
        jax.block_until_ready(q)

    assert all(q.shape == (1, N_ACTIONS_FORGET) for q in q_forget)
    assert [q.shape for q in q_remember] == [(2, N_ACTIONS_REMEMBER),
                                             (3, N_ACTIONS_REMEMBER)]
    assert all(bool(jnp.all(jnp.isfinite(q))) for q in q_forget + q_remember)

    print("KERNEL_OK")
</pallas_src>

<mosaic_0001>
module attributes {stable_mosaic.version = 11 : i64} {
  func.func @kernel(%arg0: memref<1xf32, #tpu.memory_space<smem>>, %arg1: memref<18x8xf32, #tpu.memory_space<vmem>>, %arg2: memref<18x18xf32, #tpu.memory_space<vmem>>, %arg3: memref<10x8xf32, #tpu.memory_space<vmem>>, %arg4: memref<8x18xf32, #tpu.memory_space<vmem>>, %arg5: memref<8x3xi32, #tpu.memory_space<vmem>>, %arg6: memref<120x8xf32, #tpu.memory_space<vmem>>, %arg7: memref<32x128xf32, #tpu.memory_space<vmem>>, %arg8: memref<8x128xf32, #tpu.memory_space<vmem>>, %arg9: memref<8x128xf32, #tpu.memory_space<vmem>>) attributes {dimension_semantics = [], scalar_prefetch = 0 : i64, scratch_operands = 0 : i64, tpu.core_type = #tpu.core_type<tc>} {
    %c0 = arith.constant 0 : index
    %c0_0 = arith.constant 0 : index
    %0 = vector.load %arg1[%c0, %c0_0] : memref<18x8xf32, #tpu.memory_space<vmem>>, vector<18x8xf32>
    %c0_1 = arith.constant 0 : index
    %c0_2 = arith.constant 0 : index
    %1 = vector.load %arg2[%c0_1, %c0_2] : memref<18x18xf32, #tpu.memory_space<vmem>>, vector<18x18xf32>
    %c0_3 = arith.constant 0 : index
    %c0_4 = arith.constant 0 : index
    %2 = vector.load %arg6[%c0_3, %c0_4] : memref<120x8xf32, #tpu.memory_space<vmem>>, vector<8x8xf32>
    %cst = arith.constant dense<0.000000e+00> : vector<18x8xf32>
    %3 = tpu.matmul %0, %2, %cst {dimension_numbers = #tpu.dot_dimension_numbers<[1], [0], [0], [1], [0, 0, 1, 1], [], []>} : vector<18x8xf32>, vector<8x8xf32>, vector<18x8xf32> -> vector<18x8xf32>
    %cst_5 = arith.constant dense<0.000000e+00> : vector<18x8xf32>
    %4 = tpu.matmul %1, %3, %cst_5 {dimension_numbers = #tpu.dot_dimension_numbers<[1], [0], [0], [1], [0, 0, 1, 1], [], []>} : vector<18x18xf32>, vector<18x8xf32>, vector<18x8xf32> -> vector<18x8xf32>
    %c8 = arith.constant 8 : index
    %c0_6 = arith.constant 0 : index
    %5 = vector.load %arg6[%c8, %c0_6] : memref<120x8xf32, #tpu.memory_space<vmem>>, vector<1x8xf32>
    %6 = vector.broadcast %5 : vector<1x8xf32> to vector<18x8xf32>
    %7 = arith.addf %4, %6 : vector<18x8xf32>
    %cst_7 = arith.constant 0.000000e+00 : f32
    %8 = vector.broadcast %cst_7 : f32 to vector<18x8xf32>
    %9 = arith.maximumf %7, %8 : vector<18x8xf32>
    %c16 = arith.constant 16 : index
    %c0_8 = arith.constant 0 : index
    %10 = vector.load %arg6[%c16, %c0_8] : memref<120x8xf32, #tpu.memory_space<vmem>>, vector<8x8xf32>
    %cst_9 = arith.constant dense<0.000000e+00> : vector<18x8xf32>
    %11 = tpu.matmul %9, %10, %cst_9 {dimension_numbers = #tpu.dot_dimension_numbers<[1], [0], [0], [1], [0, 0, 1, 1], [], []>} : vector<18x8xf32>, vector<8x8xf32>, vector<18x8xf32> -> vector<18x8xf32>
    %cst_10 = arith.constant dense<0.000000e+00> : vector<18x8xf32>
    %12 = tpu.matmul %1, %11, %cst_10 {dimension_numbers = #tpu.dot_dimension_numbers<[1], [0], [0], [1], [0, 0, 1, 1], [], []>} : vector<18x18xf32>, vector<18x8xf32>, vector<18x8xf32> -> vector<18x8xf32>
    %c24 = arith.constant 24 : index
    %c0_11 = arith.constant 0 : index
    %13 = vector.load %arg6[%c24, %c0_11] : memref<120x8xf32, #tpu.memory_space<vmem>>, vector<1x8xf32>
    %14 = vector.broadcast %13 : vector<1x8xf32> to vector<18x8xf32>
    %15 = arith.addf %12, %14 : vector<18x8xf32>
    %cst_12 = arith.constant 0.000000e+00 : f32
    %16 = vector.broadcast %cst_12 : f32 to vector<18x8xf32>
    %17 = arith.maximumf %15, %16 : vector<18x8xf32>
    %c0_13 = arith.constant 0 : index
    %c0_14 = arith.constant 0 : index
    %18 = vector.load %arg4[%c0_13, %c0_14] : memref<8x18xf32, #tpu.memory_space<vmem>>, vector<8x18xf32>
    %c32 = arith.constant 32 : index
    %c0_15 = arith.constant 0 : index
    %19 = vector.load %arg6[%c32, %c0_15] : memref<120x8xf32, #tpu.memory_space<vmem>>, vector<8x8xf32>
    %cst_16 = arith.constant dense<0.000000e+00> : vector<8x18xf32>
    %20 = tpu.matmul %19, %17, %cst_16 {dimension_numbers = #tpu.dot_dimension_numbers<[1], [1], [0], [0], [0, 0, 1, 0], [], []>} : vector<8x8xf32>, vector<18x8xf32>, vector<8x18xf32> -> vector<8x18xf32>
    %c0_17 = arith.constant 0 : index
    %21 = memref.load %arg0[%c0_17] : memref<1xf32, #tpu.memory_space<smem>>
    %22 = vector.broadcast %21 : f32 to vector<8x18xf32>
    %23 = arith.addf %20, %22 : vector<8x18xf32>
    %cst_18 = arith.constant 0.000000e+00 : f32
    %24 = vector.broadcast %cst_18 : f32 to vector<8x18xf32>
    %25 = arith.cmpf ogt, %18, %24 : vector<8x18xf32>
    %cst_19 = arith.constant -1.000000e+30 : f32
    %26 = vector.broadcast %cst_19 : f32 to vector<8x18xf32>
    %27 = arith.select %25, %23, %26 : vector<8x18xi1>, vector<8x18xf32>
    %cst_20 = arith.constant dense<0xFF800000> : vector<8xf32>
    %28 = vector.multi_reduction <maximumf>, %27, %cst_20 [1] : vector<8x18xf32> to vector<8xf32>
    %29 = vector.shape_cast %28 : vector<8xf32> to vector<8x1xf32>
    %30 = vector.broadcast %29 : vector<8x1xf32> to vector<8x18xf32>
    %31 = arith.subf %27, %30 : vector<8x18xf32>
    %32 = math.exp %31 : vector<8x18xf32>
    %33 = arith.mulf %32, %18 : vector<8x18xf32>
    %cst_21 = arith.constant dense<0.000000e+00> : vector<8xf32>
    %34 = vector.multi_reduction <add>, %33, %cst_21 [1] : vector<8x18xf32> to vector<8xf32>
    %35 = vector.shape_cast %34 : vector<8xf32> to vector<8x1xf32>
    %cst_22 = arith.constant 1.000000e-30 : f32
    %36 = vector.broadcast %cst_22 : f32 to vector<8x1xf32>
    %37 = arith.maximumf %35, %36 : vector<8x1xf32>
    %38 = vector.broadcast %37 : vector<8x1xf32> to vector<8x18xf32>
    %39 = arith.divf %33, %38 : vector<8x18xf32>
    %cst_23 = arith.constant dense<0.000000e+00> : vector<8x8xf32>
    %40 = tpu.matmul %39, %17, %cst_23 {dimension_numbers = #tpu.dot_dimension_numbers<[1], [0], [0], [1], [0, 0, 1, 1], [], []>} : vector<8x18xf32>, vector<18x8xf32>, vector<8x8xf32> -> vector<8x8xf32>
    %c40 = arith.constant 40 : index
    %c0_24 = arith.constant 0 : index
    %41 = vector.load %arg6[%c40, %c0_24] : memref<120x8xf32, #tpu.memory_space<vmem>>, vector<8x8xf32>
    %cst_25 = arith.constant dense<0.000000e+00> : vector<8x8xf32>
    %42 = tpu.matmul %40, %41, %cst_25 {dimension_numbers = #tpu.dot_dimension_numbers<[1], [0], [0], [1], [0, 0, 1, 1], [], []>} : vector<8x8xf32>, vector<8x8xf32>, vector<8x8xf32> -> vector<8x8xf32>
    %c48 = arith.constant 48 : index
    %c0_26 = arith.constant 0 : index
    %43 = vector.load %arg6[%c48, %c0_26] : memref<120x8xf32, #tpu.memory_space<vmem>>, vector<1x8xf32>
    %44 = vector.broadcast %43 : vector<1x8xf32> to vector<8x8xf32>
    %45 = arith.addf %42, %44 : vector<8x8xf32>
    %cst_27 = arith.constant 0.000000e+00 : f32
    %46 = vector.broadcast %cst_27 : f32 to vector<8x8xf32>
    %47 = arith.maximumf %45, %46 : vector<8x8xf32>
    %c56 = arith.constant 56 : index
    %c0_28 = arith.constant 0 : index
    %48 = vector.load %arg6[%c56, %c0_28] : memref<120x8xf32, #tpu.memory_space<vmem>>, vector<8x8xf32>
    %c64 = arith.constant 64 : index
    %c0_29 = arith.constant 0 : index
    %49 = vector.load %arg6[%c64, %c0_29] : memref<120x8xf32, #tpu.memory_space<vmem>>, vector<1x8xf32>
    %c0_30 = arith.constant 0 : index
    %c0_31 = arith.constant 0 : index
    %50 = vector.load %arg7[%c0_30, %c0_31] : memref<32x128xf32, #tpu.memory_space<vmem>>, vector<8x128xf32>
    %c8_32 = arith.constant 8 : index
    %c0_33 = arith.constant 0 : index
    %51 = vector.load %arg7[%c8_32, %c0_33] : memref<32x128xf32, #tpu.memory_space<vmem>>, vector<1x128xf32>
    %cst_34 = arith.constant dense<0.000000e+00> : vector<8x8xf32>
    %52 = tpu.matmul %47, %48, %cst_34 {dimension_numbers = #tpu.dot_dimension_numbers<[1], [0], [0], [1], [0, 0, 1, 1], [], []>} : vector<8x8xf32>, vector<8x8xf32>, vector<8x8xf32> -> vector<8x8xf32>
    %53 = vector.broadcast %49 : vector<1x8xf32> to vector<8x8xf32>
    %54 = arith.addf %52, %53 : vector<8x8xf32>
    %cst_35 = arith.constant 0.000000e+00 : f32
    %55 = vector.broadcast %cst_35 : f32 to vector<8x8xf32>
    %56 = arith.maximumf %54, %55 : vector<8x8xf32>
    %cst_36 = arith.constant dense<0.000000e+00> : vector<8x128xf32>
    %57 = tpu.matmul %56, %50, %cst_36 {dimension_numbers = #tpu.dot_dimension_numbers<[1], [0], [0], [1], [0, 0, 1, 1], [], []>} : vector<8x8xf32>, vector<8x128xf32>, vector<8x128xf32> -> vector<8x128xf32>
    %58 = vector.broadcast %51 : vector<1x128xf32> to vector<8x128xf32>
    %59 = arith.addf %57, %58 : vector<8x128xf32>
    %60 = vector.extract_strided_slice %59 {offsets = [0, 0], sizes = [8, 3], strides = [1, 1]} : vector<8x128xf32> to vector<8x3xf32>
    %61 = vector.extract_strided_slice %59 {offsets = [0, 3], sizes = [8, 1], strides = [1, 1]} : vector<8x128xf32> to vector<8x1xf32>
    %cst_37 = arith.constant dense<0.000000e+00> : vector<8xf32>
    %62 = vector.multi_reduction <add>, %60, %cst_37 [1] : vector<8x3xf32> to vector<8xf32>
    %63 = vector.shape_cast %62 : vector<8xf32> to vector<8x1xf32>
    %cst_38 = arith.constant 3.000000e+00 : f32
    %64 = vector.broadcast %cst_38 : f32 to vector<8x1xf32>
    %65 = arith.divf %63, %64 : vector<8x1xf32>
    %66 = arith.subf %61, %65 : vector<8x1xf32>
    %67 = vector.broadcast %66 : vector<8x1xf32> to vector<8x128xf32>
    %68 = arith.addf %59, %67 : vector<8x128xf32>
    %c0_39 = arith.constant 0 : index
    %c0_40 = arith.constant 0 : index
    %69 = vector.load %arg8[%c0_39, %c0_40] : memref<8x128xf32, #tpu.memory_space<vmem>>, vector<8x128xf32>
    tpu.vector_store %arg8[%c0_39, %c0_40], %68 {strides = array<i32>} : memref<8x128xf32, #tpu.memory_space<vmem>>, vector<8x128xf32>,
    %c0_41 = arith.constant 0 : index
    %c0_42 = arith.constant 0 : index
    %70 = vector.load %arg5[%c0_41, %c0_42] : memref<8x3xi32, #tpu.memory_space<vmem>>, vector<8x3xi32>
    %71 = tpu.iota {dimensions = array<i32: 1>} : vector<8x18xi32>
    %72 = tpu.iota {dimensions = array<i32: 1>} : vector<8x10xi32>
    %73 = vector.extract_strided_slice %70 {offsets = [0, 0], sizes = [8, 1], strides = [1, 1]} : vector<8x3xi32> to vector<8x1xi32>
    %74 = vector.broadcast %73 : vector<8x1xi32> to vector<8x18xi32>
    %75 = arith.cmpi eq, %71, %74 : vector<8x18xi32>
    %cst_43 = arith.constant 1.000000e+00 : f32
    %cst_44 = arith.constant 0.000000e+00 : f32
    %76 = vector.broadcast %cst_43 : f32 to vector<8x18xf32>
    %77 = vector.broadcast %cst_44 : f32 to vector<8x18xf32>
    %78 = arith.select %75, %76, %77 : vector<8x18xi1>, vector<8x18xf32>
    %79 = vector.extract_strided_slice %70 {offsets = [0, 1], sizes = [8, 1], strides = [1, 1]} : vector<8x3xi32> to vector<8x1xi32>
    %80 = vector.broadcast %79 : vector<8x1xi32> to vector<8x10xi32>
    %81 = arith.cmpi eq, %72, %80 : vector<8x10xi32>
    %cst_45 = arith.constant 1.000000e+00 : f32
    %cst_46 = arith.constant 0.000000e+00 : f32
    %82 = vector.broadcast %cst_45 : f32 to vector<8x10xf32>
    %83 = vector.broadcast %cst_46 : f32 to vector<8x10xf32>
    %84 = arith.select %81, %82, %83 : vector<8x10xi1>, vector<8x10xf32>
    %85 = vector.extract_strided_slice %70 {offsets = [0, 2], sizes = [8, 1], strides = [1, 1]} : vector<8x3xi32> to vector<8x1xi32>
    %86 = vector.broadcast %85 : vector<8x1xi32> to vector<8x18xi32>
    %87 = arith.cmpi eq, %71, %86 : vector<8x18xi32>
    %cst_47 = arith.constant 1.000000e+00 : f32
    %cst_48 = arith.constant 0.000000e+00 : f32
    %88 = vector.broadcast %cst_47 : f32 to vector<8x18xf32>
    %89 = vector.broadcast %cst_48 : f32 to vector<8x18xf32>
    %90 = arith.select %87, %88, %89 : vector<8x18xi1>, vector<8x18xf32>
    %cst_49 = arith.constant dense<0.000000e+00> : vector<8x8xf32>
    %91 = tpu.matmul %78, %17, %cst_49 {dimension_numbers = #tpu.dot_dimension_numbers<[1], [0], [0], [1], [0, 0, 1, 1], [], []>} : vector<8x18xf32>, vector<18x8xf32>, vector<8x8xf32> -> vector<8x8xf32>
    %c0_50 = arith.constant 0 : index
    %c0_51 = arith.constant 0 : index
    %92 = vector.load %arg3[%c0_50, %c0_51] : memref<10x8xf32, #tpu.memory_space<vmem>>, vector<10x8xf32>
    %cst_52 = arith.constant dense<0.000000e+00> : vector<8x8xf32>
    %93 = tpu.matmul %84, %92, %cst_52 {dimension_numbers = #tpu.dot_dimension_numbers<[1], [0], [0], [1], [0, 0, 1, 1], [], []>} : vector<8x10xf32>, vector<10x8xf32>, vector<8x8xf32> -> vector<8x8xf32>
    %cst_53 = arith.constant dense<0.000000e+00> : vector<8x8xf32>
    %94 = tpu.matmul %90, %17, %cst_53 {dimension_numbers = #tpu.dot_dimension_numbers<[1], [0], [0], [1], [0, 0, 1, 1], [], []>} : vector<8x18xf32>, vector<18x8xf32>, vector<8x8xf32> -> vector<8x8xf32>
    %c72 = arith.constant 72 : index
    %c0_54 = arith.constant 0 : index
    %95 = vector.load %arg6[%c72, %c0_54] : memref<120x8xf32, #tpu.memory_space<vmem>>, vector<8x8xf32>
    %cst_55 = arith.constant dense<0.000000e+00> : vector<8x8xf32>
    %96 = tpu.matmul %91, %95, %cst_55 {dimension_numbers = #tpu.dot_dimension_numbers<[1], [0], [0], [1], [0, 0, 1, 1], [], []>} : vector<8x8xf32>, vector<8x8xf32>, vector<8x8xf32> -> vector<8x8xf32>
    %c80 = arith.constant 80 : index
    %c0_56 = arith.constant 0 : index
    %97 = vector.load %arg6[%c80, %c0_56] : memref<120x8xf32, #tpu.memory_space<vmem>>, vector<8x8xf32>
    %cst_57 = arith.constant dense<0.000000e+00> : vector<8x8xf32>
    %98 = tpu.matmul %93, %97, %cst_57 {dimension_numbers = #tpu.dot_dimension_numbers<[1], [0], [0], [1], [0, 0, 1, 1], [], []>} : vector<8x8xf32>, vector<8x8xf32>, vector<8x8xf32> -> vector<8x8xf32>
    %99 = arith.addf %96, %98 : vector<8x8xf32>
    %c88 = arith.constant 88 : index
    %c0_58 = arith.constant 0 : index
    %100 = vector.load %arg6[%c88, %c0_58] : memref<120x8xf32, #tpu.memory_space<vmem>>, vector<8x8xf32>
    %cst_59 = arith.constant dense<0.000000e+00> : vector<8x8xf32>
    %101 = tpu.matmul %94, %100, %cst_59 {dimension_numbers = #tpu.dot_dimension_numbers<[1], [0], [0], [1], [0, 0, 1, 1], [], []>} : vector<8x8xf32>, vector<8x8xf32>, vector<8x8xf32> -> vector<8x8xf32>
    %102 = arith.addf %99, %101 : vector<8x8xf32>
    %c96 = arith.constant 96 : index
    %c0_60 = arith.constant 0 : index
    %103 = vector.load %arg6[%c96, %c0_60] : memref<120x8xf32, #tpu.memory_space<vmem>>, vector<1x8xf32>
    %104 = vector.broadcast %103 : vector<1x8xf32> to vector<8x8xf32>
    %105 = arith.addf %102, %104 : vector<8x8xf32>
    %cst_61 = arith.constant 0.000000e+00 : f32
    %106 = vector.broadcast %cst_61 : f32 to vector<8x8xf32>
    %107 = arith.maximumf %105, %106 : vector<8x8xf32>
    %c104 = arith.constant 104 : index
    %c0_62 = arith.constant 0 : index
    %108 = vector.load %arg6[%c104, %c0_62] : memref<120x8xf32, #tpu.memory_space<vmem>>, vector<8x8xf32>
    %c112 = arith.constant 112 : index
    %c0_63 = arith.constant 0 : index
    %109 = vector.load %arg6[%c112, %c0_63] : memref<120x8xf32, #tpu.memory_space<vmem>>, vector<1x8xf32>
    %c16_64 = arith.constant 16 : index
    %c0_65 = arith.constant 0 : index
    %110 = vector.load %arg7[%c16_64, %c0_65] : memref<32x128xf32, #tpu.memory_space<vmem>>, vector<8x128xf32>
    %c24_66 = arith.constant 24 : index
    %c0_67 = arith.constant 0 : index
    %111 = vector.load %arg7[%c24_66, %c0_67] : memref<32x128xf32, #tpu.memory_space<vmem>>, vector<1x128xf32>
    %cst_68 = arith.constant dense<0.000000e+00> : vector<8x8xf32>
    %112 = tpu.matmul %107, %108, %cst_68 {dimension_numbers = #tpu.dot_dimension_numbers<[1], [0], [0], [1], [0, 0, 1, 1], [], []>} : vector<8x8xf32>, vector<8x8xf32>, vector<8x8xf32> -> vector<8x8xf32>
    %113 = vector.broadcast %109 : vector<1x8xf32> to vector<8x8xf32>
    %114 = arith.addf %112, %113 : vector<8x8xf32>
    %cst_69 = arith.constant 0.000000e+00 : f32
    %115 = vector.broadcast %cst_69 : f32 to vector<8x8xf32>
    %116 = arith.maximumf %114, %115 : vector<8x8xf32>
    %cst_70 = arith.constant dense<0.000000e+00> : vector<8x128xf32>
    %117 = tpu.matmul %116, %110, %cst_70 {dimension_numbers = #tpu.dot_dimension_numbers<[1], [0], [0], [1], [0, 0, 1, 1], [], []>} : vector<8x8xf32>, vector<8x128xf32>, vector<8x128xf32> -> vector<8x128xf32>
    %118 = vector.broadcast %111 : vector<1x128xf32> to vector<8x128xf32>
    %119 = arith.addf %117, %118 : vector<8x128xf32>
    %120 = vector.extract_strided_slice %119 {offsets = [0, 0], sizes = [8, 2], strides = [1, 1]} : vector<8x128xf32> to vector<8x2xf32>
    %121 = vector.extract_strided_slice %119 {offsets = [0, 2], sizes = [8, 1], strides = [1, 1]} : vector<8x128xf32> to vector<8x1xf32>
    %cst_71 = arith.constant dense<0.000000e+00> : vector<8xf32>
    %122 = vector.multi_reduction <add>, %120, %cst_71 [1] : vector<8x2xf32> to vector<8xf32>
    %123 = vector.shape_cast %122 : vector<8xf32> to vector<8x1xf32>
    %cst_72 = arith.constant 2.000000e+00 : f32
    %124 = vector.broadcast %cst_72 : f32 to vector<8x1xf32>
    %125 = arith.divf %123, %124 : vector<8x1xf32>
    %126 = arith.subf %121, %125 : vector<8x1xf32>
    %127 = vector.broadcast %126 : vector<8x1xf32> to vector<8x128xf32>
    %128 = arith.addf %119, %127 : vector<8x128xf32>
    %c0_73 = arith.constant 0 : index
    %c0_74 = arith.constant 0 : index
    %129 = vector.load %arg9[%c0_73, %c0_74] : memref<8x128xf32, #tpu.memory_space<vmem>>, vector<8x128xf32>
    tpu.vector_store %arg9[%c0_73, %c0_74], %128 {strides = array<i32>} : memref<8x128xf32, #tpu.memory_space<vmem>>, vector<8x128xf32>,
    return
  }
}

</mosaic_0001>

<bundles_post_ra>
// kernel: tpu_custom_call.1
= control target key start
LH: loop header
LB: loop body
LE: loop exit
PB: predicated region body
PF: predicated region fallthrough
CT: control target
= control target key end

     0   :  { %16 = vsyncpa [#allocation4], 0  ;;  %vm41_vm0 = vcmask 64512   ;;  %v1838_v2 = vmov 0.0   ;;  %vm1839_vm1 = vmmov 0   ;;  %s2136_s0 = inlined_call_operand.<no memory space> [shape: f32[1], index: 0, kind: input, shape index: {}]   ;;  %s2137_s1 = inlined_call_operand.vmem [shape: f32[18,8], index: 1, kind: input, shape index: {}]   ;;  %s2138_s2 = inlined_call_operand.vmem [shape: f32[18,18], index: 2, kind: input, shape index: {}]   ;;  %s2139_s3 = inlined_call_operand.vmem [shape: f32[10,8], index: 3, kind: input, shape index: {}]   ;;  %s2140_s4 = inlined_call_operand.vmem [shape: f32[8,18], index: 4, kind: input, shape index: {}]   ;;  %s2141_s5 = inlined_call_operand.vmem [shape: s32[8,3], index: 5, kind: input, shape index: {}]   ;;  %s2142_s6 = inlined_call_operand.vmem [shape: f32[120,8], index: 6, kind: input, shape index: {}]   ;;  %s2143_s7 = inlined_call_operand.vmem [shape: f32[32,128], index: 7, kind: input, shape index: {}]   ;;  %s2144_s8 = inlined_call_operand.hbm [shape: f32[8,128], index: 8, kind: output, shape index: {0}]   ;;  %s2145_s9 = inlined_call_operand.hbm [shape: f32[8,128], index: 9, kind: output, shape index: {1}]  }
   0x1   :  { %v40_v0 = vld [vmem:[%s2142_s6] sm:$0xff]  ;;  %1614 = vmatprep.subr.mxu0 %v1838_v2  ;;  %1616 = vmatprep.mubr.msk.f32.mxu0 %vm1839_vm1, %v1838_v2 }
   0x2   :  { %v34_v1 = vld [vmem:[%s2137_s1] sm:$0xff] }
   0x3   :  { %17 = vsyncpa [#allocation6], 0  ;;  %1615 = vmatpush3.msra.mxu0 %v40_v0  ;;  %1631 = vmatprep.mubr.msk.f32.mxu1 %vm1839_vm1, %v1838_v2  ;;  %v35_v3 = vld [vmem:[%s2137_s1 + $0x8] sm:$0xff]  ;;  %v36_v4 = vld [vmem:[%s2137_s1 + $0x10] sm:$0x3]  ;;  %v1840_v5 = vmov 0.0|0.0   ;;  %v417_v53 = vstv %s2136_s0 }
   0x4   :  { %1617 = vmatmul.mubr.msk.f32.vlgmr.msra.gmra.mrb[0].mxu0 %vm41_vm0, %v34_v1  ;;  %1640 = vmatprep.subr.mxu0 %v1838_v2  ;;  %vm146_vm2 = vcmask 1041408   ;;  %v37_v13 = vld [vmem:[%s2138_s2] sm:$0xff]  ;;  %vm136_vm3 = vcmask 146432   ;;  %v38_v14 = vld [vmem:[%s2138_s2 + $0x8] sm:$0xff]  ;;  %v39_v15 = vld [vmem:[%s2138_s2 + $0x10] sm:$0x3] }
   0x5   :  { %1619 = vmatprep.mubr.msk.f32.mxu0 %vm1839_vm1, %v1838_v2  ;;  %1749 = vmatprep.subr.bf16.mxu1 %v1840_v5  ;;  %v233_v16 = vld [vmem:[%s2142_s6 + $0x10] sm:$0xff]  ;;  %v1520_v17 = vld [vmem:[%s2142_s6 + $0x8] ss:$0 sm:$0xff]  ;;  %v1528_v37 = vld [vmem:[%s2142_s6 + $0x18] ss:$0 sm:$0xff]  ;;  %vm1844_vm8 = vmmov 1  }
   0x6   :  { %1641 = vmatpush3.msra.mxu0 %v233_v16  ;;  %vm1757_vm4 = vmpackc.low %vm41_vm0, %vm41_vm0  ;;  %v415_v51 = vld [vmem:[%s2142_s6 + $0x20] sm:$0xff]  ;;  %vm936_vm10 = vcmask 80896   ;;  %vm829_vm12 = vcmask 23552   ;;  %vm1475_vm13 = vcmask 15360  }
   0x7   :  { %1755 = vmatprep.subr.bf16.mxu0 %v1840_v5  ;;  %v414_v52 = vld [vmem:[%s2140_s4] sm:$0xff]  ;;  %vm1767_vm9 = vmpackc.low %vm146_vm2, %vm1844_vm8 }
   0x8   :  { %1620 = vmatmul.mubr.msk.f32.gmra.mrb[2].mxu0 %vm41_vm0, %v35_v3  ;;  %vm500_vm5 = vcmp.gt.f32.partialorder %v414_v52, 0.0 }
   0x9   :  { %1622 = vmatprep.mubr.msk.f32.mxu0 %vm1839_vm1, %v1838_v2 }
   0xc   :  { %1623 = vmatmul.mubr.msk.f32.gmra.mrb[4].mxu0 %vm41_vm0, %v36_v4 }
   0xd   :  { %1642 = vmatprep.mubr.msk.f32.mxu0 %vm1839_vm1, %v1838_v2 }
  0xd7   :  { %v117_v6 = vpop.f32.mrb[0].mxu0 }
  0xd8   :  { %v1618_v7 = vpop.f32.mrb[1].mxu0 }
  0xd9   :  { %v590_v7 = vld [vmem:[%s2142_s6 + $0x28] sm:$0xff] }
  0xdb   :  { %v122_v8 = vpop.f32.mrb[2].mxu0 }
  0xdc   :  { %v1750_v9 = vpack.c.bf16 %v122_v8, %v117_v6  ;;  %v1621_v10 = vpop.f32.mrb[3].mxu0 }
  0xdd   :  { %v670_v10 = vld [vmem:[%s2142_s6 + $0x38] sm:$0xff] }
  0xde   :  { %1751 = vmatpush3.bf16.msra.mxu1 %v1750_v9 }
  0xdf   :  { %v127_v11 = vpop.f32.mrb[4].mxu0  ;;  %1629 = vmatprep.subr.mxu1 %v1838_v2 }
  0xe0   :  { %v1624_v12 = vpop.f32.mrb[5].mxu0 }
  0xe1   :  { %v1841_v12 = vmov 1  }
  0xe2   :  { %1630 = vmatpush3.msk.msra.mxu1 %vm146_vm2, %v127_v11  ;;  %v843_v11 = vld [vmem:[%s2141_s5] sm:$0xff]  ;;  %1782 = vset.pattern.permute.xlu1 %v1841_v12 }
  0xe3   :  { %1632 = vmatmul.mubr.msk.f32.vlgmr.msra.gmra.mrb[0].mxu1 %vm136_vm3, %v37_v13  ;;  %1752 = vmatprep.subr.bf16.mxu1 %v1840_v5 }
  0xe4   :  { %1634 = vmatprep.mubr.msk.f32.mxu1 %vm1839_vm1, %v1838_v2  ;;  %852 = vperm.xlu1 %1782, %v843_v11  }
  0xe7   :  { %1635 = vmatmul.mubr.msk.f32.gmra.mrb[2].mxu1 %vm136_vm3, %v38_v14 }
  0xe8   :  { %1637 = vmatprep.mubr.msk.f32.mxu1 %vm1839_vm1, %v1838_v2 }
  0xeb   :  { %1638 = vmatmul.mubr.msk.f32.gmra.mrb[4].mxu1 %vm136_vm3, %v39_v15 }
  0xec   :  { %1657 = vmatprep.mubr.msk.f32.mxu1 %vm1839_vm1, %v1838_v2 }
 0x1b6   :  { %v216_v18 = vpop.f32.mrb[0].mxu1 }
 0x1b7   :  { %v217_v19 = vadd.f32 %v1520_v17, %v216_v18  ;;  %v1633_v20 = vpop.f32.mrb[1].mxu1 }
 0x1b8   :  { %v672_v20 = vld [vmem:[%s2143_s7] sm:$0xff] }
 0x1b9   :  { %v230_v21 = vmax.f32 %v217_v19, 0.0 }
 0x1ba   :  { %v221_v22 = vpop.f32.mrb[2].mxu1 }
 0x1bb   :  { %v222_v23 = vadd.f32 %v1520_v17, %v221_v22  ;;  %v1636_v24 = vpop.f32.mrb[3].mxu1  ;;  %1643 = vmatmul.mubr.msk.f32.vlgmr.msra.gmra.mrb[6].mxu0 %vm41_vm0, %v230_v21  ;;  %v844_v21 = vlaneseq }
 0x1bc   :  { %1645 = vmatprep.mubr.msk.f32.mxu0 %vm1839_vm1, %v1838_v2 }
 0x1bd   :  { %v231_v25 = vmax.f32 %v222_v23, 0.0  ;;  %v845_v22 = vand.u32 127, %v844_v21  ;;  %v853_v23 = vpop.permute.xlu1 %852 }
 0x1be   :  { %v226_v26 = vpop.f32.mrb[4].mxu1 }
 0x1bf   :  { %1646 = vmatmul.mubr.msk.f32.gmra.mrb[8].mxu0 %vm41_vm0, %v231_v25  ;;  %v227_v27 = vadd.f32 %v1520_v17, %v226_v26  ;;  %v1639_v28 = vpop.f32.mrb[5].mxu1  ;;  %vm854_vm6 = vcmp.eq.s32.totalorder %v845_v22, %v853_v23  ;;  %v1541_v26 = vld [vmem:[%s2142_s6 + $0x40] ss:$0 sm:$0xff] }
 0x1c0   :  { %1648 = vmatprep.mubr.msk.f32.mxu0 %vm1839_vm1, %v1838_v2  ;;  %v935_v28 = vld [vmem:[%s2139_s3 + $0x8] sm:$0x3] }
 0x1c1   :  { %v232_v29 = vmax.f32 %v227_v27, 0.0  ;;  %v934_v27 = vld [vmem:[%s2139_s3] sm:$0xff] }
 0x1c3   :  { %1649 = vmatmul.mubr.msk.f32.gmra.mrb[10].mxu0 %vm41_vm0, %v232_v29 }
 0x1c4   :  { %1672 = vmatprep.mubr.msk.f32.mxu0 %vm1839_vm1, %v1838_v2 }
 0x28e   :  { %v309_v30 = vpop.f32.mrb[6].mxu0 }
 0x28f   :  { %v1644_v31 = vpop.f32.mrb[7].mxu0 }
 0x292   :  { %v314_v32 = vpop.f32.mrb[8].mxu0 }
 0x293   :  { %v1753_v33 = vpack.c.bf16 %v314_v32, %v309_v30  ;;  %v1647_v34 = vpop.f32.mrb[9].mxu0  ;;  %v1766_v32 = vpack.c.bf16 %v935_v28, %v934_v27 }
 0x294   :  { %v855_v34 = vsel %vm854_vm6, 1.0, %v1838_v2 }
 0x295   :  { %1754 = vmatpush3.bf16.msra.mxu1 %v1753_v33 }
 0x296   :  { %v319_v35 = vpop.f32.mrb[10].mxu0  ;;  %1655 = vmatprep.subr.mxu1 %v1838_v2 }
 0x297   :  { %v1650_v36 = vpop.f32.mrb[11].mxu0 }
 0x299   :  { %1656 = vmatpush3.msk.msra.mxu1 %vm146_vm2, %v319_v35 }
 0x29a   :  { %1658 = vmatmul.mubr.msk.f32.vlgmr.msra.gmra.mrb[6].mxu1 %vm136_vm3, %v37_v13  ;;  %1759 = vmatprep.subr.bf16.mxu1 %v1840_v5  ;;  %v1842_v13 = vmov 2  }
 0x29b   :  { %1660 = vmatprep.mubr.msk.f32.mxu1 %vm1839_vm1, %v1838_v2  ;;  %1784 = vset.pattern.permute.xlu0 %v1842_v13 }
 0x29e   :  { %1661 = vmatmul.mubr.msk.f32.gmra.mrb[8].mxu1 %vm136_vm3, %v38_v14  ;;  %v1843_v14 = vmov 0  }
 0x29f   :  { %1663 = vmatprep.mubr.msk.f32.mxu1 %vm1839_vm1, %v1838_v2  ;;  %1783 = vset.pattern.permute.xlu1 %v1843_v14 }
 0x2a0   :  { %847 = vperm.xlu1 %1783, %v843_v11  }
 0x2a2   :  { %1664 = vmatmul.mubr.msk.f32.gmra.mrb[10].mxu1 %vm136_vm3, %v39_v15  ;;  %v1539_v15 = vld [vmem:[%s2142_s6 + $0x30] ss:$0 sm:$0xff] }
 0x2a3   :  { %1681 = vmatprep.mubr.msk.f32.mxu1 %vm1839_vm1, %v1838_v2 }
 0x31f   :  { %v848_v24 = vpop.permute.xlu1 %847 }
 0x320   :  { %vm849_vm7 = vcmp.eq.s32.totalorder %v845_v22, %v848_v24 }
 0x321   :  { %v850_v25 = vsel %vm849_vm7, 1.0, %v1838_v2 }
 0x36d   :  { %v397_v38 = vpop.f32.mrb[6].mxu1 }
 0x36e   :  { %v1659_v39 = vpop.f32.mrb[7].mxu1  ;;  %v398_v40 = vadd.f32 %v1528_v37, %v397_v38  ;;  %v1234_v38 = vld [vmem:[%s2142_s6 + $0x58] sm:$0xff] }
 0x370   :  { %v411_v44 = vmax.f32 %v398_v40, 0.0  ;;  %v1543_v40 = vld [vmem:[%s2143_s7 + $0x8] ss:$0 sm:$0xff] }
 0x371   :  { %v402_v41 = vpop.f32.mrb[8].mxu1 }
 0x372   :  { %v403_v42 = vadd.f32 %v1528_v37, %v402_v41  ;;  %v1662_v43 = vpop.f32.mrb[9].mxu1 }
 0x374   :  { %v412_v45 = vmax.f32 %v403_v42, 0.0 }
 0x375   :  { %v407_v46 = vpop.f32.mrb[10].mxu1 }
 0x376   :  { %v1980_v47 = vpack.c.bf16 %v412_v45, %v411_v44  ;;  %v408_v48 = vadd.f32 %v1528_v37, %v407_v46  ;;  %v1665_v49 = vpop.f32.mrb[11].mxu1  ;;  %v1086_v45 = vld [vmem:[%s2142_s6 + $0x48] sm:$0xff] }
 0x378   :  { %1758 = vmatpush3.bf16.xpose.msk.msra.mxu0 %vm1757_vm4, %v1980_v47  ;;  %1761 = vmatpush3.bf16.msra.mxu1 %v1980_v47  ;;  %v1984_v50 = vmax.f32 %v408_v48, 0.0 }
 0x379   :  { %1670 = vmatprep.subr.mxu0 %v1838_v2  ;;  %1679 = vmatprep.subr.mxu1 %v1838_v2 }
 0x37c   :  { %1680 = vmatpush3.msk.msra.mxu1 %vm146_vm2, %v1984_v50 }
 0x37d   :  { %1694 = vmatprep.subr.mxu1 %v1838_v2 }
 0x380   :  { %1671 = vmatpush3.xpose.msk.msra.mxu0 %vm41_vm0, %v1984_v50 }
 0x381   :  { %1684 = vmatprep.subr.mxu0 %v1838_v2 }
 0x383   :  { %1673 = vmatmul.mubr.msk.f32.vlgmr.msra.gmra.mrb[12].mxu0 %vm41_vm0, %v415_v51 }
 0x384   :  { %1686 = vmatprep.mubr.msk.f32.mxu0 %vm1839_vm1, %v1838_v2  ;;  %1685 = vmatpush3.msra.mxu0 %v590_v7 }
 0x385   :  { %1689 = vmatprep.subr.mxu0 %v1838_v2 }
 0x456   :  { %v496_v54 = vpop.f32.mrb[12].mxu0 }
 0x457   :  { %v497_v55 = vadd.f32 %v496_v54, %v417_v53  ;;  %v1674_v56 = vpop.f32.mrb[13].mxu0 }
 0x459   :  { %v501_v57 = vsel %vm500_vm5, %v497_v55, -1e+30 }
 0x45a   :  { %v502_v58 = vsel %vm136_vm3, %v501_v57, -inf }
 0x45b   :  { %503 = vmax.xlane.f32.xlu0 %v502_v58 }
 0x4e8   :  { %v504_v59 = vpop.xlane.xlu0 %503 }
 0x4e9   :  { %v505_v60 = vsub.f32 %v501_v57, %v504_v59  ;;  %v1554_v57 = vld [vmem:[%s2142_s6 + $0x60] ss:$0 sm:$0xff] }
 0x4eb   :  { %v506_v61 = vmul.f32 1.442695, %v505_v60 }
 0x4ed   :  { %1786 = vpow2.f32 %v506_v61 }
 0x4f7   :  { %v1787_v62 = vpop.eup %1786 }
 0x4f8   :  { %v508_v63 = vmul.f32 %v1787_v62, %v414_v52  ;;  %v1555_v62 = vld [vmem:[%s2142_s6 + $0x70] ss:$0 sm:$0xff] }
 0x4fa   :  { %v509_v0 = vsel %vm136_vm3, %v508_v63, 0.0 }
 0x4fb   :  { %510 = vadd.xlane.f32.xlu0 %v509_v0 }
 0x511   :  { %857 = vperm.xlu0 %1784, %v843_v11  }
 0x588   :  { %v511_v1 = vpop.xlane.xlu0 %510 }
 0x589   :  { %v512_v3 = vmax.f32 %v511_v1, 1e-30 }
 0x58b   :  { %1788 = vrcp.f32 %v512_v3 }
 0x590   :  { %v858_v35 = vpop.permute.xlu0 %857 }
 0x591   :  { %vm859_vm11 = vcmp.eq.s32.totalorder %v845_v22, %v858_v35 }
 0x592   :  { %v860_v36 = vsel %vm859_vm11, 1.0, %v1838_v2 }
 0x595   :  { %v1789_v4 = vpop.eup %1788 }
 0x596   :  { %v514_v6 = vmul.f32 %v1789_v4, %v508_v63  ;;  %v1845_v4 = vmov 3  }
 0x597   :  { %1785 = vset.pattern.permute.xlu1 %v1845_v4 }
 0x598   :  { %1682 = vmatmul.mubr.msk.f32.vlgmr.msra.gmra.mrb[12].mxu1 %vm136_vm3, %v514_v6  ;;  %v1557_v6 = vld [vmem:[%s2143_s7 + $0x18] ss:$0 sm:$0xff] }
 0x599   :  { %1696 = vmatprep.mubr.msk.f32.mxu1 %vm1839_vm1, %v1838_v2  ;;  %1695 = vmatpush3.msra.mxu1 %v672_v20 }
 0x59a   :  { %1765 = vmatprep.subr.bf16.mxu1 %v1840_v5 }
 0x66b   :  { %v586_v8 = vpop.f32.mrb[12].mxu1 }
 0x66c   :  { %v1683_v9 = vpop.f32.mrb[13].mxu1  ;;  %1687 = vmatmul.mubr.msk.f32.vlgmr.msra.gmra.mrb[14].mxu0 %vm41_vm0, %v586_v8 }
 0x66d   :  { %1691 = vmatprep.mubr.msk.f32.mxu0 %vm1839_vm1, %v1838_v2  ;;  %1690 = vmatpush3.msra.mxu0 %v670_v10 }
 0x66e   :  { %1762 = vmatprep.subr.bf16.mxu0 %v1840_v5 }
 0x73f   :  { %v665_v16 = vpop.f32.mrb[14].mxu0 }
 0x740   :  { %v666_v17 = vadd.f32 %v1539_v15, %v665_v16  ;;  %v1688_v18 = vpop.f32.mrb[15].mxu0 }
 0x742   :  { %v669_v19 = vmax.f32 %v666_v17, 0.0 }
 0x744   :  { %1692 = vmatmul.mubr.msk.f32.vlgmr.msra.gmra.mrb[16].mxu0 %vm41_vm0, %v669_v19 }
 0x745   :  { %1764 = vmatpush3.bf16.msra.mxu0 %v1980_v47  ;;  %1705 = vmatprep.mubr.msk.f32.mxu0 %vm1839_vm1, %v1838_v2 }
 0x746   :  { %1703 = vmatprep.subr.mxu0 %v1838_v2 }
 0x749   :  { %1704 = vmatpush3.msk.msra.mxu0 %vm146_vm2, %v1984_v50 }
 0x74a   :  { %1724 = vmatprep.subr.mxu0 %v1838_v2  ;;  %1706 = vmatmul.mubr.msk.f32.vlgmr.msra.gmra.mrb[18].mxu0 %vm136_vm3, %v850_v25 }
 0x74b   :  { %1726 = vmatprep.mubr.msk.f32.mxu0 %vm1839_vm1, %v1838_v2 }
 0x817   :  { %v747_v29 = vpop.f32.mrb[16].mxu0 }
 0x818   :  { %v748_v30 = vadd.f32 %v1541_v26, %v747_v29  ;;  %v1693_v31 = vpop.f32.mrb[17].mxu0 }
 0x81a   :  { %v751_v33 = vmax.f32 %v748_v30, 0.0 }
 0x81c   :  { %1697 = vmatmul.mubr.msk.f32.vlgmr.msra.gmra.mrb[14].mxu1 %vm41_vm0, %v751_v33 }
 0x81d   :  { %1768 = vmatpush3.bf16.msk.msra.mxu1 %vm1767_vm9, %v1766_v32  ;;  %1712 = vmatprep.mubr.msk.f32.mxu1 %vm1839_vm1, %v1838_v2  ;;  %v930_v37 = vpop.f32.mrb[18].mxu0 }
 0x81e   :  { %1769 = vmatprep.subr.bf16.mxu1 %v1840_v5  ;;  %v1087_v5 = vld [vmem:[%s2142_s6 + $0x50] sm:$0xff]  ;;  %v1707_v39 = vpop.f32.mrb[19].mxu0 }
 0x81f   :  { %1725 = vmatpush3.msra.mxu0 %v1087_v5 }
 0x820   :  { %1713 = vmatmul.mubr.msk.f32.vlgmr.msra.gmra.mrb[16].mxu1 %vm936_vm10, %v855_v34  ;;  %1729 = vmatprep.subr.mxu0 %v1838_v2 }
 0x821   :  { %1771 = vmatpush3.bf16.msra.mxu1 %v1980_v47  ;;  %1721 = vmatprep.mubr.msk.f32.mxu1 %vm1839_vm1, %v1838_v2 }
 0x822   :  { %1719 = vmatprep.subr.mxu1 %v1838_v2 }
 0x825   :  { %1720 = vmatpush3.msk.msra.mxu1 %vm146_vm2, %v1984_v50  ;;  %v1316_v50 = vld [vmem:[%s2142_s6 + $0x68] sm:$0xff]  ;;  %s1846_s6 = smov [#allocation3]  }
 0x826   :  { %1722 = vmatmul.mubr.msk.f32.vlgmr.msra.gmra.mrb[18].mxu1 %vm136_vm3, %v860_v36  ;;  %1734 = vmatprep.subr.mxu1 %v1838_v2  ;;  %s1495_s1 = sshll.u32 %s1846_s6, 4  ;;  %s1496_s1 = int_to_ptr.vmem [resolvable:$true] %s1495_s1 }
 0x827   :  { %1736 = vmatprep.mubr.msk.f32.mxu1 %vm1839_vm1, %v1838_v2  ;;  %1735 = vmatpush3.msra.mxu1 %v1234_v38  ;;  %p1795_p1 = scmp.lt.s32.totalorder %s1496_s1, %s1496_s1 }
 0x828   :  { %1744 = vmatprep.subr.mxu1 %v1838_v2 }
 0x8ef   :  { %v825_v41 = vpop.f32.mrb[14].mxu1 }
 0x8f0   :  { %v826_v42 = vadd.f32 %v1543_v40, %v825_v41  ;;  %v1698_v43 = vpop.f32.mrb[15].mxu1 }
 0x8f2   :  { %v830_v44 = vsel %vm829_vm12, %v826_v42, 0.0 }
 0x8f3   :  { %831 = vadd.xlane.f32.xlu1 %v830_v44  ;;  %v1009_v46 = vpop.f32.mrb[16].mxu1 }
 0x8f4   :  { %1727 = vmatmul.mubr.msk.f32.vlgmr.msra.gmra.mrb[20].mxu0 %vm41_vm0, %v1009_v46  ;;  %v1714_v47 = vpop.f32.mrb[17].mxu1 }
 0x8f5   :  { %1730 = vmatpush3.msra.mxu0 %v1086_v45  ;;  %1731 = vmatprep.mubr.msk.f32.mxu0 %vm1839_vm1, %v1838_v2 }
 0x8f6   :  { %1739 = vmatprep.subr.mxu0 %v1838_v2 }
 0x8f8   :  { %1732 = vmatmul.mubr.msk.f32.vlgmr.msra.gmra.mrb[22].mxu0 %vm41_vm0, %v930_v37 }
 0x8f9   :  { %v1082_v48 = vpop.f32.mrb[18].mxu1  ;;  %1741 = vmatprep.mubr.msk.f32.mxu0 %vm1839_vm1, %v1838_v2  ;;  %1740 = vmatpush3.msra.mxu0 %v1316_v50 }
 0x8fa   :  { %1737 = vmatmul.mubr.msk.f32.vlgmr.msra.gmra.mrb[20].mxu1 %vm41_vm0, %v1082_v48  ;;  %v1723_v49 = vpop.f32.mrb[19].mxu1 }
 0x8fb   :  { %1746 = vmatprep.mubr.msk.f32.mxu1 %vm1839_vm1, %v1838_v2  ;;  %v1318_v2 = vld [vmem:[%s2143_s7 + $0x10] sm:$0xff]  ;;  %s1790_s7 = scalar_lea.vmem %s1496_s1, 128 }
 0x8fc   :  { %1745 = vmatpush3.msra.mxu1 %v1318_v2  ;;  %p1791_p0 = scmp.ne.s32.totalorder %s1496_s1, %s1790_s7  ;;  %p1796_p2 = scmp.lt.s32.totalorder %s1790_s7, %s1790_s7 }
 0x8fe   :  { %p1797_p3 = por %p1796_p2, %p1795_p1 }
 0x900   :  { %p1798_p4 = pnand %p1797_p3, %p1791_p0 }
 0x980   :  { %v832_v11 = vpop.xlane.xlu1 %831 }
 0x981   :  { %v834_v12 = vmul.f32 0.33333334, %v832_v11 }
 0x983   :  { %v835_v13 = vsub.f32 %v826_v42, %v834_v12 }
 0x9c7   :  { %v1157_v51 = vpop.f32.mrb[20].mxu0 }
 0x9c8   :  { %v1728_v52 = vpop.f32.mrb[21].mxu0 }
 0x9cb   :  { %v1230_v53 = vpop.f32.mrb[22].mxu0 }
 0x9cc   :  { %v1231_v54 = vadd.f32 %v1230_v53, %v1157_v51  ;;  %v1733_v55 = vpop.f32.mrb[23].mxu0 }
 0x9cd   :  { %v1304_v56 = vpop.f32.mrb[20].mxu1 }
 0x9ce   :  { %v1308_v58 = vadd.f32 %v1304_v56, %v1231_v54  ;;  %v1738_v59 = vpop.f32.mrb[21].mxu1 }
 0x9d0   :  { %v1314_v60 = vadd.f32 %v1554_v57, %v1308_v58 }
 0x9d2   :  { %v1315_v61 = vmax.f32 %v1314_v60, 0.0 }
 0x9d4   :  { %1742 = vmatmul.mubr.msk.f32.vlgmr.msra.gmra.mrb[24].mxu0 %vm41_vm0, %v1315_v61 }
 0xaa7   :  { %v1393_v63 = vpop.f32.mrb[24].mxu0 }
 0xaa8   :  { %v1394_v0 = vadd.f32 %v1555_v62, %v1393_v63  ;;  %v1743_v1 = vpop.f32.mrb[25].mxu0 }
 0xaaa   :  { %v1397_v3 = vmax.f32 %v1394_v0, 0.0 }
 0xaac   :  { %1747 = vmatmul.mubr.msk.f32.vlgmr.msra.gmra.mrb[22].mxu1 %vm41_vm0, %v1397_v3 }
 0xb7f   :  { %v1471_v7 = vpop.f32.mrb[22].mxu1 }
 0xb80   :  { %v1472_v8 = vadd.f32 %v1557_v6, %v1471_v7  ;;  %v1748_v9 = vpop.f32.mrb[23].mxu1 }
 0xb82   :  { %v1476_v10 = vsel %vm1475_vm13, %v1472_v8, 0.0 }
 0xb83   :  { %1477 = vadd.xlane.f32.xlu1 %v1476_v10 }
 0xb94   :  { %838 = vperm.xlu1 %1785, %v835_v13  }
 0xc10   :  { %v1478_v14 = vpop.xlane.xlu1 %1477 }
 0xc11   :  { %v1480_v15 = vmul.f32 0.5, %v1478_v14 }
 0xc13   :  { %v1481_v16 = vsub.f32 %v1472_v8, %v1480_v15 }
 0xc14   :  { %v839_v17 = vpop.permute.xlu1 %838 }
 0xc15   :  { %v841_v18 = vadd.f32 %v839_v17, %v826_v42  ;;  %1484 = vperm.xlu0 %1784, %v1481_v16  }
 0xc17   :  { %842 = vst [vmem:[#allocation3] sm:$0xff] %v841_v18 }
 0xc18   :  { %1801 = shalt.err (!%p1798_p4)
}
 0xc19   :  { %s1802_s18 = scalar_lea.hbm %s2144_s8, 128 }
 0xc1a   :  { %p1803_p5 = scmp.ne.s32.totalorder %s2144_s8, %s1802_s18  ;;  %p1806_p6 = scmp.lt.u32.totalorder %s1802_s18, %s2144_s8 }
 0xc1c   :  { %p1808_p7 = pnand %p1806_p6, %p1803_p5 }
 0xc1e   :  { %1811 = shalt.err (!%p1808_p7)
}
 0xc1f   :  { %1498 = dma.vmem_to_hbm [thread:$0]  %s1496_s1, 128, %s2144_s8, [#allocation4]  }
 0xc20   :  { %s1847_s24 = smov [#allocation5]  }
 0xc21   :  { %s1505_s25 = sshll.u32 %s1847_s24, 4  ;;  %s1506_s25 = int_to_ptr.vmem [resolvable:$true] %s1505_s25 }
 0xc22   :  { %s1812_s2 = scalar_lea.vmem %s1506_s25, 128  ;;  %p1817_p9 = scmp.lt.s32.totalorder %s1506_s25, %s1506_s25 }
 0xc23   :  { %p1813_p8 = scmp.ne.s32.totalorder %s1506_s25, %s1812_s2  ;;  %p1818_p10 = scmp.lt.s32.totalorder %s1812_s2, %s1812_s2 }
 0xc25   :  { %p1819_p11 = por %p1818_p10, %p1817_p9 }
 0xc27   :  { %p1820_p12 = pnand %p1819_p11, %p1813_p8 }
 0xc94   :  { %v1485_v19 = vpop.permute.xlu0 %1484 }
 0xc95   :  { %v1487_v20 = vadd.f32 %v1485_v19, %v1472_v8 }
 0xc97   :  { %1488 = vst [vmem:[#allocation5] sm:$0xff] %v1487_v20 }
 0xc98   :  { %1823 = shalt.err (!%p1820_p12)
}
 0xc99   :  { %s1824_s28 = scalar_lea.hbm %s2145_s9, 128 }
 0xc9a   :  { %p1825_p13 = scmp.ne.s32.totalorder %s2145_s9, %s1824_s28  ;;  %p1828_p0 = scmp.lt.u32.totalorder %s1824_s28, %s2145_s9 }
 0xc9c   :  { %p1830_p1 = pnand %p1828_p0, %p1825_p13 }
 0xc9e   :  { %1833 = shalt.err (!%p1830_p1)
}
 0xc9f   :  { %1508 = dma.vmem_to_hbm [thread:$0]  %s1506_s25, 128, %s2145_s9, [#allocation6]  }
 0xca0   :  { %1834 = dma.done.wait [#allocation4], 128  }
 0xca1   :  { %1835 = vsyncadd [#allocation4], 4294967168 }
 0xca2   :  { %1836 = dma.done.wait [#allocation6], 128  }
 0xca3   :  { %1837 = vsyncadd [#allocation6], 4294967168 }
 0xca4   :  { %1515 = vsyncpa [#allocation4], 1 }
 0xca5   :  { %1516 = vsyncpa [#allocation6], 1 }

</bundles_post_ra>
